<compile_context>
chip_gen: v7x
topology: tpu7x:2x2x1
jax: 0.10.0
libtpu: 0.0.40
codegen_flags: <defaults>
</compile_context>

<pallas_src>
import functools

import jax
import jax.numpy as jnp
from jax.experimental import pallas as pl
from jax.experimental.pallas import tpu as pltpu


def _round_up(n: int, m: int) -> int:
    return ((n + m - 1) // m) * m


def dual_stack_kernel(w_ref, b_ref, z_ref, zo_ref, *, num_layers):
    """Runs the whole fused layer stack on one (TM, F) row tile.

    w_ref : (L, F, F) bf16   packed [[Wx, Wyx], [Wxy, Wy]] per layer
    b_ref : (L, 1, F) f32    packed [bx | by]             per layer
    z_ref : (TM, F)   f32    packed [x | y] rows for this tile
    zo_ref: (TM, F)   f32    output tile (aliased with the z input buffer)
    """
    z = z_ref[...]                                    # read input tile once
    for l in range(num_layers):                       # static, fully unrolled
        zw = jnp.dot(z.astype(jnp.bfloat16), w_ref[l],
                     preferred_element_type=jnp.float32)
        z = jnp.maximum(zw + b_ref[l], 0.0)
    zo_ref[...] = z                                    # write output tile once


def pack_dual_params(params):
    """Fuse + pad the per-layer dual-stream weights ONCE (call at init time).

    Returns (w, b):
      w: (L, F, F) bf16,  F = round_up(2D, 128)
      b: (L, 1, F) f32
    """
    L, D, _ = params["wx"].shape
    D2 = 2 * D
    F = _round_up(D2, 128)

    w_top = jnp.concatenate([params["wx"], params["wyx"]], axis=-1)  # (L, D, 2D)
    w_bot = jnp.concatenate([params["wxy"], params["wy"]], axis=-1)  # (L, D, 2D)
    w = jnp.concatenate([w_top, w_bot], axis=1)                      # (L, 2D, 2D)
    b = jnp.concatenate([params["bx"], params["by"]], axis=-1)       # (L, 1, 2D)

    if F != D2:
        w = jnp.pad(w, ((0, 0), (0, F - D2), (0, F - D2)))
        b = jnp.pad(b, ((0, 0), (0, 0), (0, F - D2)))

    return w.astype(jnp.bfloat16), b.astype(jnp.float32)


def dual_sequential(x, y, w, b, *, tm=512):
    """x, y: (B, S, D).  w: (L, F, F) bf16, b: (L, 1, F) f32 (pre-packed)."""
    B, S, D = x.shape
    M = B * S
    L, F, _ = w.shape
    D2 = 2 * D

    # ---- pack the dual streams: z = [x | y], zero-pad to lane-dense F ------
    z = jnp.concatenate([x.reshape(M, D), y.reshape(M, D)],
                        axis=-1).astype(jnp.float32)                  # (M, 2D)
    if F != D2:
        z = jnp.pad(z, ((0, 0), (0, F - D2)))

    # ---- row tiling: keep >= 2 M-tiles when possible (v7x megacore) --------
    TM = min(tm, _round_up(max(pl.cdiv(M, 2), 8), 8))
    Mp = _round_up(M, TM)
    if Mp != M:
        z = jnp.pad(z, ((0, Mp - M), (0, 0)))
    grid = (Mp // TM,)

    # ---- VMEM budget (double-buffered W/b/z/out) + headroom, capped 32 MiB --
    vmem_need = (2 * L * F * F * 2          # bf16 weight stack
                 + 2 * L * 8 * F * 4        # bias stack (sublane-padded)
                 + 2 * TM * F * 4           # input tile
                 + 2 * TM * F * 4)          # output tile
    vmem_limit = int(min(max(2 * vmem_need + (2 << 20), 16 << 20), 32 << 20))

    zo = pl.pallas_call(
        functools.partial(dual_stack_kernel, num_layers=L),
        out_shape=jax.ShapeDtypeStruct((Mp, F), jnp.float32),
        grid_spec=pltpu.PrefetchScalarGridSpec(
            num_scalar_prefetch=0,
            grid=grid,
            in_specs=[
                pl.BlockSpec((L, F, F), lambda mi: (0, 0, 0)),  # full W stack
                pl.BlockSpec((L, 1, F), lambda mi: (0, 0, 0)),  # full b stack
                pl.BlockSpec((TM, F), lambda mi: (mi, 0)),      # z row tile
            ],
            out_specs=pl.BlockSpec((TM, F), lambda mi: (mi, 0)),
        ),
        input_output_aliases={2: 0},   # packed input buffer is the output buffer
        compiler_params=pltpu.CompilerParams(
            dimension_semantics=("parallel",),
            vmem_limit_bytes=vmem_limit,
        ),
    )(w, b, z)

    xo = zo[:M, :D].reshape(B, S, D).astype(x.dtype)
    yo = zo[:M, D:D2].reshape(B, S, D).astype(y.dtype)
    return xo, yo


def dual_sequential_ref(x, y, params):
    """Pure-JAX (f32) reference of the same DualSequential stack."""
    L = params["wx"].shape[0]
    for l in range(L):
        x_new = jnp.maximum(
            x @ params["wx"][l] + y @ params["wxy"][l] + params["bx"][l, 0], 0.0)
        y_new = jnp.maximum(
            y @ params["wy"][l] + x @ params["wyx"][l] + params["by"][l, 0], 0.0)
        x, y = x_new, y_new
    return x, y


if __name__ == "__main__":
    B, S, D, L = 2, 128, 32, 3

    key = jax.random.PRNGKey(0)
    kx, ky, kw1, kw2, kw3, kw4, kb1, kb2 = jax.random.split(key, 8)

    x = jax.random.normal(kx, (B, S, D), dtype=jnp.float32)
    y = jax.random.normal(ky, (B, S, D), dtype=jnp.float32)

    scale = 1.0 / jnp.sqrt(jnp.float32(D))
    params = {
        "wx":  jax.random.normal(kw1, (L, D, D), dtype=jnp.float32) * scale,
        "wxy": jax.random.normal(kw2, (L, D, D), dtype=jnp.float32) * scale,
        "wy":  jax.random.normal(kw3, (L, D, D), dtype=jnp.float32) * scale,
        "wyx": jax.random.normal(kw4, (L, D, D), dtype=jnp.float32) * scale,
        "bx":  jax.random.normal(kb1, (L, 1, D), dtype=jnp.float32) * 0.1,
        "by":  jax.random.normal(kb2, (L, 1, D), dtype=jnp.float32) * 0.1,
    }

    # Pack / pad / cast the weights ONCE (not per forward call).
    w_packed, b_packed = pack_dual_params(params)
    w_packed, b_packed = jax.block_until_ready((w_packed, b_packed))

    run = jax.jit(dual_sequential)
    xo, yo = run(x, y, w_packed, b_packed)
    jax.block_until_ready((xo, yo))

    # f32 reference; kernel uses bf16 MXU inputs with f32 accumulation.
    xr, yr = dual_sequential_ref(x, y, params)

    def rel_err(a, r):
        return jnp.linalg.norm((a - r).ravel()) / jnp.linalg.norm(r.ravel())

    assert rel_err(xo, xr) < 2e-2, f"x stream mismatch: rel_err={rel_err(xo, xr)}"
    assert rel_err(yo, yr) < 2e-2, f"y stream mismatch: rel_err={rel_err(yo, yr)}"

    print("KERNEL_OK")
</pallas_src>

<mosaic_0001>
module attributes {stable_mosaic.version = 11 : i64} {
  func.func @dual_stack_kernel(%arg0: i32, %arg1: memref<3x128x128xbf16, #tpu.memory_space<vmem>>, %arg2: memref<3x1x128xf32, #tpu.memory_space<vmem>>, %arg3: memref<128x128xf32, #tpu.memory_space<vmem>>, %arg4: memref<128x128xf32, #tpu.memory_space<vmem>>) attributes {dimension_semantics = [#tpu.dimension_semantics<parallel>], iteration_bounds = array<i64: 2>, scalar_prefetch = 0 : i64, scratch_operands = 0 : i64, tpu.core_type = #tpu.core_type<tc>, window_params = [{pipeline_mode = #tpu.pipeline_mode<synchronous>, transform_indices = @transform_0, window_bounds = array<i64: 3, 128, 128>}, {pipeline_mode = #tpu.pipeline_mode<synchronous>, transform_indices = @transform_1, window_bounds = array<i64: 3, 1, 128>}, {transform_indices = @transform_2, window_bounds = array<i64: 128, 128>}, {transform_indices = @transform_3, window_bounds = array<i64: 128, 128>}]} {
    %c0 = arith.constant 0 : index
    %c0_0 = arith.constant 0 : index
    %0 = vector.load %arg3[%c0, %c0_0] : memref<128x128xf32, #tpu.memory_space<vmem>>, vector<128x128xf32>
    %1 = arith.truncf %0 : vector<128x128xf32> to vector<128x128xbf16>
    %c0_1 = arith.constant 0 : index
    %c0_2 = arith.constant 0 : index
    %c0_3 = arith.constant 0 : index
    %2 = vector.load %arg1[%c0_1, %c0_2, %c0_3] : memref<3x128x128xbf16, #tpu.memory_space<vmem>>, vector<1x128x128xbf16>
    %3 = vector.shape_cast %2 : vector<1x128x128xbf16> to vector<128x128xbf16>
    %cst = arith.constant dense<0.000000e+00> : vector<128x128xf32>
    %4 = tpu.matmul %1, %3, %cst {dimension_numbers = #tpu.dot_dimension_numbers<[1], [0], [0], [1], [0, 0, 1, 1], [], []>} : vector<128x128xbf16>, vector<128x128xbf16>, vector<128x128xf32> -> vector<128x128xf32>
    %c0_4 = arith.constant 0 : index
    %c0_5 = arith.constant 0 : index
    %c0_6 = arith.constant 0 : index
    %5 = vector.load %arg2[%c0_4, %c0_5, %c0_6] : memref<3x1x128xf32, #tpu.memory_space<vmem>>, vector<1x1x128xf32>
    %6 = vector.shape_cast %5 : vector<1x1x128xf32> to vector<1x128xf32>
    %7 = vector.broadcast %6 : vector<1x128xf32> to vector<128x128xf32>
    %8 = arith.addf %4, %7 : vector<128x128xf32>
    %cst_7 = arith.constant 0.000000e+00 : f32
    %9 = vector.broadcast %cst_7 : f32 to vector<128x128xf32>
    %10 = arith.maximumf %8, %9 : vector<128x128xf32>
    %11 = arith.truncf %10 : vector<128x128xf32> to vector<128x128xbf16>
    %c1 = arith.constant 1 : index
    %c0_8 = arith.constant 0 : index
    %c0_9 = arith.constant 0 : index
    %12 = vector.load %arg1[%c1, %c0_8, %c0_9] : memref<3x128x128xbf16, #tpu.memory_space<vmem>>, vector<1x128x128xbf16>
    %13 = vector.shape_cast %12 : vector<1x128x128xbf16> to vector<128x128xbf16>
    %cst_10 = arith.constant dense<0.000000e+00> : vector<128x128xf32>
    %14 = tpu.matmul %11, %13, %cst_10 {dimension_numbers = #tpu.dot_dimension_numbers<[1], [0], [0], [1], [0, 0, 1, 1], [], []>} : vector<128x128xbf16>, vector<128x128xbf16>, vector<128x128xf32> -> vector<128x128xf32>
    %c1_11 = arith.constant 1 : index
    %c0_12 = arith.constant 0 : index
    %c0_13 = arith.constant 0 : index
    %15 = vector.load %arg2[%c1_11, %c0_12, %c0_13] : memref<3x1x128xf32, #tpu.memory_space<vmem>>, vector<1x1x128xf32>
    %16 = vector.shape_cast %15 : vector<1x1x128xf32> to vector<1x128xf32>
    %17 = vector.broadcast %16 : vector<1x128xf32> to vector<128x128xf32>
    %18 = arith.addf %14, %17 : vector<128x128xf32>
    %cst_14 = arith.constant 0.000000e+00 : f32
    %19 = vector.broadcast %cst_14 : f32 to vector<128x128xf32>
    %20 = arith.maximumf %18, %19 : vector<128x128xf32>
    %21 = arith.truncf %20 : vector<128x128xf32> to vector<128x128xbf16>
    %c2 = arith.constant 2 : index
    %c0_15 = arith.constant 0 : index
    %c0_16 = arith.constant 0 : index
    %22 = vector.load %arg1[%c2, %c0_15, %c0_16] : memref<3x128x128xbf16, #tpu.memory_space<vmem>>, vector<1x128x128xbf16>
    %23 = vector.shape_cast %22 : vector<1x128x128xbf16> to vector<128x128xbf16>
    %cst_17 = arith.constant dense<0.000000e+00> : vector<128x128xf32>
    %24 = tpu.matmul %21, %23, %cst_17 {dimension_numbers = #tpu.dot_dimension_numbers<[1], [0], [0], [1], [0, 0, 1, 1], [], []>} : vector<128x128xbf16>, vector<128x128xbf16>, vector<128x128xf32> -> vector<128x128xf32>
    %c2_18 = arith.constant 2 : index
    %c0_19 = arith.constant 0 : index
    %c0_20 = arith.constant 0 : index
    %25 = vector.load %arg2[%c2_18, %c0_19, %c0_20] : memref<3x1x128xf32, #tpu.memory_space<vmem>>, vector<1x1x128xf32>
    %26 = vector.shape_cast %25 : vector<1x1x128xf32> to vector<1x128xf32>
    %27 = vector.broadcast %26 : vector<1x128xf32> to vector<128x128xf32>
    %28 = arith.addf %24, %27 : vector<128x128xf32>
    %cst_21 = arith.constant 0.000000e+00 : f32
    %29 = vector.broadcast %cst_21 : f32 to vector<128x128xf32>
    %30 = arith.maximumf %28, %29 : vector<128x128xf32>
    %c0_22 = arith.constant 0 : index
    %c0_23 = arith.constant 0 : index
    %31 = vector.load %arg4[%c0_22, %c0_23] : memref<128x128xf32, #tpu.memory_space<vmem>>, vector<128x128xf32>
    tpu.vector_store %arg4[%c0_22, %c0_23], %30 {strides = array<i32>} : memref<128x128xf32, #tpu.memory_space<vmem>>, vector<128x128xf32>,
    return
  }
  func.func @transform_0(%arg0: i32) -> (i32, i32, i32) {
    %c0_i32 = arith.constant 0 : i32
    %c0_i32_0 = arith.constant 0 : i32
    %c0_i32_1 = arith.constant 0 : i32
    %c0_i32_2 = arith.constant 0 : i32
    return %c0_i32, %c0_i32_0, %c0_i32_1 : i32, i32, i32
  }
  func.func @transform_1(%arg0: i32) -> (i32, i32, i32) {
    %c0_i32 = arith.constant 0 : i32
    %c0_i32_0 = arith.constant 0 : i32
    %c0_i32_1 = arith.constant 0 : i32
    %c0_i32_2 = arith.constant 0 : i32
    return %c0_i32, %c0_i32_0, %c0_i32_1 : i32, i32, i32
  }
  func.func @transform_2(%arg0: i32) -> (i32, i32) {
    %c0_i32 = arith.constant 0 : i32
    %c0_i32_0 = arith.constant 0 : i32
    return %arg0, %c0_i32 : i32, i32
  }
  func.func @transform_3(%arg0: i32) -> (i32, i32) {
    %c0_i32 = arith.constant 0 : i32
    %c0_i32_0 = arith.constant 0 : i32
    return %arg0, %c0_i32 : i32, i32
  }
}

</mosaic_0001>

<bundles_post_ra>
// kernel: dual_sequential.1
= control target key start
LH: loop header
LB: loop body
LE: loop exit
PB: predicated region body
PF: predicated region fallthrough
CT: control target
= control target key end

     0   :  { %s1135_s12 = smov 0   ;;  %s1312_s0 = inlined_call_operand.vmem [shape: bf16[3,128,128], index: 0, kind: input, shape index: {}]   ;;  %s1313_s1 = inlined_call_operand.vmem [shape: f32[3,1,128], index: 1, kind: input, shape index: {}]   ;;  %s1314_s2 = inlined_call_operand.vmem [shape: f32[256,128], index: 2, kind: input, shape index: {}, may-alias: {2,3}]   ;;  %s1315_s3 = inlined_call_operand.vmem [shape: f32[256,128], index: 3, kind: output, shape index: {}, may-alias: {2,3}]  }
   0x1 LB: > { %s843_s13 = sadd.s32 4294967295, %s1113_s12   ;;  %p847_p0 = scmp.ge.s32.totalorder %s1113_s12, 1  ;;  %s1113_s12 = sphi %s1135_s12, %s13_s12  }
   0x2   : > { %p138_p1 = scmp.lt.s32.totalorder %s1113_s12, 3 }
   0x4   : > { %p139_p2 = pnand %p847_p0, %p138_p1 }
   0x5   : > { %v1083_v0 = vld [vmem:[%s1312_s0] sm:$0xff] (!%p139_p2)   ;;  %s848_s16 = sshll.u32 (!%p139_p2), %s843_s13, 4  ;;  %v1084_v1 = vld [vmem:[%s1312_s0 + $0x8] sm:$0xff] (!%p139_p2)   ;;  %v1085_v2 = vld [vmem:[%s1312_s0 + $0x10] sm:$0xff] (!%p139_p2)  }
   0x6   : > { %142 = sbr.rel (%p139_p2) target bundleno = 726 (0x2d6), region = 32  ;;  %p163_p3 = scmp.lt.s32.totalorder (!%p139_p2), %s848_s16, 31  ;;  %963 = vmatprep.subr.bf16.mxu0 (!%p139_p2), %v1083_v0  ;;  %v1086_v3 = vld [vmem:[%s1312_s0 + $0x18] sm:$0xff] (!%p139_p2)   ;;  %v1087_v7 = vld [vmem:[%s1312_s0 + $0x20] sm:$0xff] (!%p139_p2)   ;;  %v1092_v9 = vld [vmem:[%s1312_s0 + $0x48] sm:$0xff] (!%p139_p2)  }
   0x7   : > { %964 = vmatpush3.bf16.msra.mxu0 (!%p139_p2), %v1083_v0  ;;  %v1091_v8 = vld [vmem:[%s1312_s0 + $0x40] sm:$0xff] (!%p139_p2)   ;;  %v1088_v10 = vld [vmem:[%s1312_s0 + $0x28] sm:$0xff] (!%p139_p2)   ;;  %v1093_v11 = vld [vmem:[%s1312_s0 + $0x50] sm:$0xff] (!%p139_p2)  }
   0x8   : > { %965 = vmatprep.subr.bf16.mxu0 (!%p139_p2), %v1084_v1  ;;  %995 = vmatprep.subr.bf16.mxu1 (!%p139_p2), %v1091_v8  ;;  %v1089_v12 = vld [vmem:[%s1312_s0 + $0x30] sm:$0xff] (!%p139_p2)   ;;  %v1094_v13 = vld [vmem:[%s1312_s0 + $0x58] sm:$0xff] (!%p139_p2)   ;;  %v1095_v15 = vld [vmem:[%s1312_s0 + $0x60] sm:$0xff] (!%p139_p2)  }
   0x9   : > { %996 = vmatpush3.bf16.msra.mxu1 (!%p139_p2), %v1091_v8  ;;  %v1090_v14 = vld [vmem:[%s1312_s0 + $0x38] sm:$0xff] (!%p139_p2)   ;;  %v1096_v21 = vld [vmem:[%s1312_s0 + $0x68] sm:$0xff] (!%p139_p2)   ;;  %v1097_v38 = vld [vmem:[%s1312_s0 + $0x70] sm:$0xff] (!%p139_p2)  }
   0xa   : > { %997 = vmatprep.subr.bf16.mxu1 (!%p139_p2), %v1092_v9  ;;  %v1098_v39 = vld [vmem:[%s1312_s0 + $0x78] sm:$0xff] (!%p139_p2)   ;;  %v1099_v40 = vld [vmem:[%s1312_s0 + $0x80] sm:$0xff] (!%p139_p2)   ;;  %v1100_v41 = vld [vmem:[%s1312_s0 + $0x88] sm:$0xff] (!%p139_p2)  }
   0xb   : > { %966 = vmatpush3.bf16.msra.mxu0 (!%p139_p2), %v1084_v1  ;;  %v1101_v42 = vld [vmem:[%s1312_s0 + $0x90] sm:$0xff] (!%p139_p2)   ;;  %v1229_v43 = vld [vmem:[%s1312_s0 + $0x98] sm:$0xff] (!%p139_p2)   ;;  %v1235_v44 = vld [vmem:[%s1312_s0 + $0xa0] sm:$0xff] (!%p139_p2)  }
   0xc   : > { %967 = vmatprep.subr.bf16.mxu0 (!%p139_p2), %v1085_v2  ;;  %v1242_v45 = vld [vmem:[%s1312_s0 + $0xa8] sm:$0xff] (!%p139_p2)   ;;  %v1250_v46 = vld [vmem:[%s1313_s1] ss:$0 sm:$0xff] (!%p139_p2) }
   0xd   : > { %s1317_s16 = smov (!%p163_p3, %s848_s16), 31  ;;  %998 = vmatpush3.bf16.msra.mxu1 %v1092_v9 }
   0xe   : > { %s849_s21 = sshll.u32 %s1317_s16, 3  ;;  %999 = vmatprep.subr.bf16.mxu1 %v1093_v11 }
   0xf   : > { %s1160_s24 = scalar_lea.vmem %s1314_s2, %s849_s21  ;;  %968 = vmatpush3.bf16.msra.mxu0 %v1085_v2  ;;  %s1291_s28 = scalar_lea.vmem %s1315_s3, %s849_s21 }
  0x10   : > { %v175_v4 = vld [vmem:[%s1160_s24] sm:$0xff]  ;;  %v176_v5 = vld [vmem:[%s1160_s24 + $0x8] sm:$0xff]  ;;  %969 = vmatprep.subr.bf16.mxu0 %v1086_v3  ;;  %v177_v16 = vld [vmem:[%s1160_s24 + $0x10] sm:$0xff] }
  0x11   : > { %v191_v6 = vpack.c.bf16 %v176_v5, %v175_v4  ;;  %1000 = vmatpush3.bf16.msra.mxu1 %v1093_v11  ;;  %v178_v17 = vld [vmem:[%s1160_s24 + $0x18] sm:$0xff]  ;;  %v179_v18 = vld [vmem:[%s1160_s24 + $0x20] sm:$0xff]  ;;  %v180_v19 = vld [vmem:[%s1160_s24 + $0x28] sm:$0xff] }
  0x12   : > { %1001 = vmatprep.subr.bf16.mxu1 %v1094_v13  ;;  %v192_v20 = vpack.c.bf16 %v178_v17, %v177_v16  ;;  %v193_v22 = vpack.c.bf16 %v180_v19, %v179_v18  ;;  %v181_v23 = vld [vmem:[%s1160_s24 + $0x30] sm:$0xff]  ;;  %v182_v24 = vld [vmem:[%s1160_s24 + $0x38] sm:$0xff]  ;;  %v183_v25 = vld [vmem:[%s1160_s24 + $0x40] sm:$0xff] }
  0x13   : > { %979 = vmatprep.mubr.bf16.mxu0 %v191_v6  ;;  %970 = vmatpush3.bf16.msra.mxu0 %v1086_v3  ;;  %v184_v26 = vld [vmem:[%s1160_s24 + $0x48] sm:$0xff]  ;;  %v194_v27 = vpack.c.bf16 %v182_v24, %v181_v23  ;;  %v185_v29 = vld [vmem:[%s1160_s24 + $0x50] sm:$0xff]  ;;  %v186_v30 = vld [vmem:[%s1160_s24 + $0x58] sm:$0xff] }
  0x14   : > { %971 = vmatprep.subr.bf16.mxu0 %v1087_v7  ;;  %v195_v28 = vpack.c.bf16 %v184_v26, %v183_v25  ;;  %v187_v31 = vld [vmem:[%s1160_s24 + $0x60] sm:$0xff]  ;;  %v188_v32 = vld [vmem:[%s1160_s24 + $0x68] sm:$0xff]  ;;  %v196_v33 = vpack.c.bf16 %v186_v30, %v185_v29  ;;  %v189_v35 = vld [vmem:[%s1160_s24 + $0x70] sm:$0xff] }
  0x15   : > { %1002 = vmatpush3.bf16.msra.mxu1 %v1094_v13  ;;  %v197_v34 = vpack.c.bf16 %v188_v32, %v187_v31  ;;  %v190_v36 = vld [vmem:[%s1160_s24 + $0x78] sm:$0xff] }
  0x16   : > { %1003 = vmatprep.subr.bf16.mxu1 %v1095_v15  ;;  %v198_v37 = vpack.c.bf16 %v190_v36, %v189_v35 }
  0x17   : > { %972 = vmatpush3.bf16.msra.mxu0 %v1087_v7 }
  0x18   : > { %973 = vmatprep.subr.bf16.mxu0 %v1088_v10 }
  0x19   : > { %1004 = vmatpush3.bf16.msra.mxu1 %v1095_v15 }
  0x1a   : > { %1005 = vmatprep.subr.bf16.mxu1 %v1096_v21 }
  0x1b   : > { %974 = vmatpush3.bf16.msra.mxu0 %v1088_v10 }
  0x1c   : > { %975 = vmatprep.subr.bf16.mxu0 %v1089_v12 }
  0x1d   : > { %1006 = vmatpush3.bf16.msra.mxu1 %v1096_v21 }
  0x1e   : > { %1007 = vmatprep.subr.bf16.mxu1 %v1097_v38 }
  0x1f   : > { %976 = vmatpush3.bf16.msra.mxu0 %v1089_v12 }
  0x20   : > { %977 = vmatprep.subr.bf16.mxu0 %v1090_v14 }
  0x21   : > { %1008 = vmatpush3.bf16.msra.mxu1 %v1097_v38 }
  0x22   : > { %1009 = vmatprep.subr.bf16.mxu1 %v1098_v39 }
  0x23   : > { %978 = vmatpush3.bf16.msra.mxu0 %v1090_v14 }
  0x24   : > { %1027 = vmatprep.subr.bf16.mxu0 %v1099_v40 }
  0x25   : > { %1010 = vmatpush3.bf16.msra.mxu1 %v1098_v39  ;;  %v1105_v39 = vld [vmem:[%s1312_s0 + $0xb0] sm:$0xff]  }
  0x26   : > { %980 = vmatmul.mubr.bf16.vlgmr.msra.gmra.mrb[0].mxu0 %v192_v20  ;;  %1059 = vmatprep.subr.bf16.mxu1 %v1099_v40 }
  0x27   : > { %983 = vmatprep.mubr.bf16.mxu0 %v193_v22  ;;  %1028 = vmatpush3.bf16.msra.mxu0 %v1099_v40 }
  0x28   : > { %1029 = vmatprep.subr.bf16.mxu0 %v1100_v41 }
  0x2b   : > { %1030 = vmatpush3.bf16.msra.mxu0 %v1100_v41 }
  0x2c   : > { %1031 = vmatprep.subr.bf16.mxu0 %v1101_v42 }
  0x2e   : > { %984 = vmatmul.mubr.bf16.gmra.mrb[4].mxu0 %v194_v27 }
  0x2f   : > { %987 = vmatprep.mubr.bf16.mxu0 %v195_v28  ;;  %1032 = vmatpush3.bf16.msra.mxu0 %v1101_v42 }
  0x30   : > { %1033 = vmatprep.subr.bf16.mxu0 %v1229_v43 }
  0x33   : > { %1034 = vmatpush3.bf16.msra.mxu0 %v1229_v43 }
  0x34   : > { %1035 = vmatprep.subr.bf16.mxu0 %v1235_v44 }
  0x36   : > { %988 = vmatmul.mubr.bf16.gmra.mrb[8].mxu0 %v196_v33 }
  0x37   : > { %991 = vmatprep.mubr.bf16.mxu0 %v197_v34  ;;  %1036 = vmatpush3.bf16.msra.mxu0 %v1235_v44 }
  0x38   : > { %1037 = vmatprep.subr.bf16.mxu0 %v1242_v45 }
  0x3b   : > { %1038 = vmatpush3.bf16.msra.mxu0 %v1242_v45 }
  0x3c   : > { %1039 = vmatprep.subr.bf16.mxu0 %v1105_v39 }
  0x3e   : > { %992 = vmatmul.mubr.bf16.gmra.mrb[12].mxu0 %v198_v37 }
  0x3f   : > { %1040 = vmatpush3.bf16.msra.mxu0 %v1105_v39 }
  0xf9   : > { %v981_v47 = vpop.f32.mrb[0].mxu0 }
  0xfa   : > { %v313_v48 = vadd.f32 %v981_v47, %v1250_v46  ;;  %v304_v49 = vpop.f32.mrb[1].mxu0 }
  0xfb   : > { %v305_v50 = vadd.f32 %v1250_v46, %v304_v49  ;;  %v982_v51 = vpop.f32.mrb[2].mxu0 }
  0xfc   : > { %v316_v52 = vadd.f32 %v982_v51, %v1250_v46  ;;  %v307_v53 = vpop.f32.mrb[3].mxu0  ;;  %v369_v55 = vmax.f32 %v313_v48, 0.0 }
  0xfd   : > { %v308_v54 = vadd.f32 %v1250_v46, %v307_v53  ;;  %v367_v57 = vmax.f32 %v305_v50, 0.0 }
  0xfe   : > { %v370_v56 = vmax.f32 %v316_v52, 0.0 }
  0xff   : > { %v368_v58 = vmax.f32 %v308_v54, 0.0 }
 0x100   : > { %v384_v59 = vpack.c.bf16 %v370_v56, %v369_v55 }
 0x101   : > { %v985_v60 = vpop.f32.mrb[4].mxu0  ;;  %v383_v61 = vpack.c.bf16 %v368_v58, %v367_v57 }
 0x102   : > { %v329_v62 = vadd.f32 %v985_v60, %v1250_v46  ;;  %v320_v63 = vpop.f32.mrb[5].mxu0 }
 0x103   : > { %v321_v0 = vadd.f32 %v1250_v46, %v320_v63  ;;  %v986_v1 = vpop.f32.mrb[6].mxu0  ;;  %1011 = vmatprep.mubr.bf16.mxu1 %v383_v61 }
 0x104   : > { %v332_v2 = vadd.f32 %v986_v1, %v1250_v46  ;;  %v323_v3 = vpop.f32.mrb[7].mxu0  ;;  %1012 = vmatmul.mubr.bf16.vlgmr.msra.gmra.mrb[0].mxu1 %v384_v59  ;;  %v373_v5 = vmax.f32 %v329_v62, 0.0 }
 0x105   : > { %v324_v4 = vadd.f32 %v1250_v46, %v323_v3  ;;  %1067 = vmatpush3.bf16.msra.mxu1 %v1099_v40  ;;  %v371_v7 = vmax.f32 %v321_v0, 0.0  ;;  %v1106_v40 = vld [vmem:[%s1312_s0 + $0xb8] sm:$0xff]  }
 0x106   : > { %v374_v6 = vmax.f32 %v332_v2, 0.0  ;;  %1060 = vmatprep.subr.bf16.mxu1 %v1100_v41  ;;  %1041 = vmatprep.subr.bf16.mxu0 %v1106_v40 }
 0x107   : > { %v372_v8 = vmax.f32 %v324_v4, 0.0  ;;  %1042 = vmatpush3.bf16.msra.mxu0 %v1106_v40 }
 0x108   : > { %v386_v9 = vpack.c.bf16 %v374_v6, %v373_v5 }
 0x109   : > { %v385_v10 = vpack.c.bf16 %v372_v8, %v371_v7  ;;  %v989_v11 = vpop.f32.mrb[8].mxu0  ;;  %1068 = vmatpush3.bf16.msra.mxu1 %v1100_v41  ;;  %v878_v41 = vld [vmem:[%s1313_s1 + $0x1] ss:$0 sm:$0xff] }
 0x10a   : > { %v345_v12 = vadd.f32 %v989_v11, %v1250_v46  ;;  %v336_v13 = vpop.f32.mrb[9].mxu0  ;;  %1061 = vmatprep.subr.bf16.mxu1 %v1101_v42 }
 0x10b   : > { %v337_v14 = vadd.f32 %v1250_v46, %v336_v13  ;;  %v990_v15 = vpop.f32.mrb[10].mxu0  ;;  %1015 = vmatprep.mubr.bf16.mxu1 %v385_v10 }
 0x10c   : > { %v348_v16 = vadd.f32 %v990_v15, %v1250_v46  ;;  %v339_v17 = vpop.f32.mrb[11].mxu0  ;;  %1016 = vmatmul.mubr.bf16.gmra.mrb[4].mxu1 %v386_v9  ;;  %v377_v19 = vmax.f32 %v345_v12, 0.0 }
 0x10d   : > { %v340_v18 = vadd.f32 %v1250_v46, %v339_v17  ;;  %1069 = vmatpush3.bf16.msra.mxu1 %v1101_v42  ;;  %v375_v21 = vmax.f32 %v337_v14, 0.0 }
 0x10e   : > { %v378_v20 = vmax.f32 %v348_v16, 0.0  ;;  %1062 = vmatprep.subr.bf16.mxu1 %v1229_v43 }
 0x10f   : > { %v376_v22 = vmax.f32 %v340_v18, 0.0 }
 0x110   : > { %v388_v23 = vpack.c.bf16 %v378_v20, %v377_v19 }
 0x111   : > { %v387_v24 = vpack.c.bf16 %v376_v22, %v375_v21  ;;  %v993_v25 = vpop.f32.mrb[12].mxu0  ;;  %1070 = vmatpush3.bf16.msra.mxu1 %v1229_v43 }
 0x112   : > { %v361_v26 = vadd.f32 %v993_v25, %v1250_v46  ;;  %v352_v27 = vpop.f32.mrb[13].mxu0  ;;  %1063 = vmatprep.subr.bf16.mxu1 %v1235_v44 }
 0x113   : > { %v353_v28 = vadd.f32 %v1250_v46, %v352_v27  ;;  %v994_v29 = vpop.f32.mrb[14].mxu0  ;;  %1019 = vmatprep.mubr.bf16.mxu1 %v387_v24 }
 0x114   : > { %v364_v30 = vadd.f32 %v994_v29, %v1250_v46  ;;  %v355_v31 = vpop.f32.mrb[15].mxu0  ;;  %1020 = vmatmul.mubr.bf16.gmra.mrb[8].mxu1 %v388_v23  ;;  %v381_v33 = vmax.f32 %v361_v26, 0.0 }
 0x115   : > { %v356_v32 = vadd.f32 %v1250_v46, %v355_v31  ;;  %1071 = vmatpush3.bf16.msra.mxu1 %v1235_v44  ;;  %v379_v35 = vmax.f32 %v353_v28, 0.0 }
 0x116   : > { %v382_v34 = vmax.f32 %v364_v30, 0.0  ;;  %1064 = vmatprep.subr.bf16.mxu1 %v1242_v45 }
 0x117   : > { %v380_v36 = vmax.f32 %v356_v32, 0.0 }
 0x118   : > { %v390_v37 = vpack.c.bf16 %v382_v34, %v381_v33  ;;  %v904_v34 = vld [vmem:[%s1313_s1 + $0x2] ss:$0 sm:$0xff] }
 0x119   : > { %v389_v38 = vpack.c.bf16 %v380_v36, %v379_v35  ;;  %1072 = vmatpush3.bf16.msra.mxu1 %v1242_v45 }
 0x11a   : > { %1065 = vmatprep.subr.bf16.mxu1 %v1105_v39 }
 0x11b   : > { %1023 = vmatprep.mubr.bf16.mxu1 %v389_v38 }
 0x11c   : > { %1024 = vmatmul.mubr.bf16.gmra.mrb[12].mxu1 %v390_v37 }
 0x11d   : > { %1073 = vmatpush3.bf16.msra.mxu1 %v1105_v39 }
 0x11e   : > { %1066 = vmatprep.subr.bf16.mxu1 %v1106_v40 }
 0x121   : > { %1074 = vmatpush3.bf16.msra.mxu1 %v1106_v40 }
 0x1d7   : > { %v1013_v42 = vpop.f32.mrb[0].mxu1 }
 0x1d8   : > { %v507_v43 = vadd.f32 %v1013_v42, %v878_v41  ;;  %v498_v44 = vpop.f32.mrb[1].mxu1 }
 0x1d9   : > { %v499_v45 = vadd.f32 %v878_v41, %v498_v44  ;;  %v1014_v46 = vpop.f32.mrb[2].mxu1 }
 0x1da   : > { %v510_v47 = vadd.f32 %v1014_v46, %v878_v41  ;;  %v501_v48 = vpop.f32.mrb[3].mxu1  ;;  %v563_v50 = vmax.f32 %v507_v43, 0.0 }
 0x1db   : > { %v502_v49 = vadd.f32 %v878_v41, %v501_v48  ;;  %v561_v52 = vmax.f32 %v499_v45, 0.0 }
 0x1dc   : > { %v564_v51 = vmax.f32 %v510_v47, 0.0 }
 0x1dd   : > { %v562_v53 = vmax.f32 %v502_v49, 0.0 }
 0x1de   : > { %v578_v54 = vpack.c.bf16 %v564_v51, %v563_v50 }
 0x1df   : > { %v577_v55 = vpack.c.bf16 %v562_v53, %v561_v52  ;;  %v1017_v56 = vpop.f32.mrb[4].mxu1 }
 0x1e0   : > { %v523_v57 = vadd.f32 %v1017_v56, %v878_v41  ;;  %v514_v58 = vpop.f32.mrb[5].mxu1 }
 0x1e1   : > { %v515_v59 = vadd.f32 %v878_v41, %v514_v58  ;;  %v1018_v60 = vpop.f32.mrb[6].mxu1  ;;  %1043 = vmatprep.mubr.bf16.mxu0 %v577_v55 }
 0x1e2   : > { %v526_v61 = vadd.f32 %v1018_v60, %v878_v41  ;;  %v517_v62 = vpop.f32.mrb[7].mxu1  ;;  %1044 = vmatmul.mubr.bf16.vlgmr.msra.gmra.mrb[16].mxu0 %v578_v54  ;;  %v567_v0 = vmax.f32 %v523_v57, 0.0 }
 0x1e3   : > { %v518_v63 = vadd.f32 %v878_v41, %v517_v62  ;;  %v565_v2 = vmax.f32 %v515_v59, 0.0 }
 0x1e4   : > { %v568_v1 = vmax.f32 %v526_v61, 0.0 }
 0x1e5   : > { %v566_v3 = vmax.f32 %v518_v63, 0.0 }
 0x1e6   : > { %v580_v4 = vpack.c.bf16 %v568_v1, %v567_v0 }
 0x1e7   : > { %v579_v5 = vpack.c.bf16 %v566_v3, %v565_v2  ;;  %v1021_v6 = vpop.f32.mrb[8].mxu1 }
 0x1e8   : > { %v539_v7 = vadd.f32 %v1021_v6, %v878_v41  ;;  %v530_v8 = vpop.f32.mrb[9].mxu1 }
 0x1e9   : > { %v531_v9 = vadd.f32 %v878_v41, %v530_v8  ;;  %v1022_v10 = vpop.f32.mrb[10].mxu1  ;;  %1047 = vmatprep.mubr.bf16.mxu0 %v579_v5 }
 0x1ea   : > { %v542_v11 = vadd.f32 %v1022_v10, %v878_v41  ;;  %v533_v12 = vpop.f32.mrb[11].mxu1  ;;  %1048 = vmatmul.mubr.bf16.gmra.mrb[20].mxu0 %v580_v4  ;;  %v571_v14 = vmax.f32 %v539_v7, 0.0 }
 0x1eb   : > { %v534_v13 = vadd.f32 %v878_v41, %v533_v12  ;;  %v569_v16 = vmax.f32 %v531_v9, 0.0 }
 0x1ec   : > { %v572_v15 = vmax.f32 %v542_v11, 0.0 }
 0x1ed   : > { %v570_v17 = vmax.f32 %v534_v13, 0.0 }
 0x1ee   : > { %v582_v18 = vpack.c.bf16 %v572_v15, %v571_v14 }
 0x1ef   : > { %v581_v19 = vpack.c.bf16 %v570_v17, %v569_v16  ;;  %v1025_v20 = vpop.f32.mrb[12].mxu1 }
 0x1f0   : > { %v555_v21 = vadd.f32 %v1025_v20, %v878_v41  ;;  %v546_v22 = vpop.f32.mrb[13].mxu1 }
 0x1f1   : > { %v547_v23 = vadd.f32 %v878_v41, %v546_v22  ;;  %v1026_v24 = vpop.f32.mrb[14].mxu1  ;;  %1051 = vmatprep.mubr.bf16.mxu1 %v581_v19 }
 0x1f2   : > { %v558_v25 = vadd.f32 %v1026_v24, %v878_v41  ;;  %v549_v26 = vpop.f32.mrb[15].mxu1  ;;  %1052 = vmatmul.mubr.bf16.vlgmr.msra.gmra.mrb[16].mxu1 %v582_v18  ;;  %v575_v28 = vmax.f32 %v555_v21, 0.0 }
 0x1f3   : > { %v550_v27 = vadd.f32 %v878_v41, %v549_v26  ;;  %v573_v30 = vmax.f32 %v547_v23, 0.0 }
 0x1f4   : > { %v576_v29 = vmax.f32 %v558_v25, 0.0 }
 0x1f5   : > { %v574_v31 = vmax.f32 %v550_v27, 0.0 }
 0x1f6   : > { %v584_v32 = vpack.c.bf16 %v576_v29, %v575_v28 }
 0x1f7   : > { %v583_v33 = vpack.c.bf16 %v574_v31, %v573_v30 }
 0x1f9   : > { %1055 = vmatprep.mubr.bf16.mxu1 %v583_v33 }
 0x1fa   : > { %1056 = vmatmul.mubr.bf16.gmra.mrb[20].mxu1 %v584_v32 }
 0x2b5   : > { %v1045_v35 = vpop.f32.mrb[16].mxu0 }
 0x2b6   : > { %v701_v36 = vadd.f32 %v1045_v35, %v904_v34  ;;  %v692_v37 = vpop.f32.mrb[17].mxu0 }
 0x2b7   : > { %v693_v38 = vadd.f32 %v904_v34, %v692_v37  ;;  %v1046_v39 = vpop.f32.mrb[18].mxu0 }
 0x2b8   : > { %v757_v40 = vmax.f32 %v701_v36, 0.0  ;;  %v704_v41 = vadd.f32 %v1046_v39, %v904_v34  ;;  %v695_v42 = vpop.f32.mrb[19].mxu0 }
 0x2b9   : > { %v755_v43 = vmax.f32 %v693_v38, 0.0  ;;  %v696_v44 = vadd.f32 %v904_v34, %v695_v42 }
 0x2ba   : > { %773 = vst [vmem:[%s1291_s28 + $0x10] sm:$0xff] %v757_v40  ;;  %v758_v45 = vmax.f32 %v704_v41, 0.0 }
 0x2bb   : > { %771 = vst [vmem:[%s1291_s28] sm:$0xff] %v755_v43  ;;  %v756_v46 = vmax.f32 %v696_v44, 0.0 }
 0x2bc   : > { %774 = vst [vmem:[%s1291_s28 + $0x18] sm:$0xff] %v758_v45 }
 0x2bd   : > { %772 = vst [vmem:[%s1291_s28 + $0x8] sm:$0xff] %v756_v46  ;;  %v1049_v47 = vpop.f32.mrb[20].mxu0 }
 0x2be   : > { %v717_v48 = vadd.f32 %v1049_v47, %v904_v34  ;;  %v708_v49 = vpop.f32.mrb[21].mxu0 }
 0x2bf   : > { %v709_v50 = vadd.f32 %v904_v34, %v708_v49  ;;  %v1050_v51 = vpop.f32.mrb[22].mxu0 }
 0x2c0   : > { %v761_v52 = vmax.f32 %v717_v48, 0.0  ;;  %v720_v53 = vadd.f32 %v1050_v51, %v904_v34  ;;  %v711_v54 = vpop.f32.mrb[23].mxu0 }
 0x2c1   : > { %v759_v55 = vmax.f32 %v709_v50, 0.0  ;;  %v712_v56 = vadd.f32 %v904_v34, %v711_v54 }
 0x2c2   : > { %777 = vst [vmem:[%s1291_s28 + $0x30] sm:$0xff] %v761_v52  ;;  %v762_v57 = vmax.f32 %v720_v53, 0.0 }
 0x2c3   : > { %775 = vst [vmem:[%s1291_s28 + $0x20] sm:$0xff] %v759_v55  ;;  %v760_v58 = vmax.f32 %v712_v56, 0.0 }
 0x2c4   : > { %778 = vst [vmem:[%s1291_s28 + $0x38] sm:$0xff] %v762_v57 }
 0x2c5   : > { %776 = vst [vmem:[%s1291_s28 + $0x28] sm:$0xff] %v760_v58  ;;  %v1053_v59 = vpop.f32.mrb[16].mxu1 }
 0x2c6   : > { %v733_v60 = vadd.f32 %v1053_v59, %v904_v34  ;;  %v724_v61 = vpop.f32.mrb[17].mxu1 }
 0x2c7   : > { %v725_v62 = vadd.f32 %v904_v34, %v724_v61  ;;  %v1054_v63 = vpop.f32.mrb[18].mxu1 }
 0x2c8   : > { %v765_v0 = vmax.f32 %v733_v60, 0.0  ;;  %v736_v1 = vadd.f32 %v1054_v63, %v904_v34  ;;  %v727_v2 = vpop.f32.mrb[19].mxu1 }
 0x2c9   : > { %v763_v3 = vmax.f32 %v725_v62, 0.0  ;;  %v728_v4 = vadd.f32 %v904_v34, %v727_v2 }
 0x2ca   : > { %781 = vst [vmem:[%s1291_s28 + $0x50] sm:$0xff] %v765_v0  ;;  %v766_v5 = vmax.f32 %v736_v1, 0.0 }
 0x2cb   : > { %779 = vst [vmem:[%s1291_s28 + $0x40] sm:$0xff] %v763_v3  ;;  %v764_v6 = vmax.f32 %v728_v4, 0.0 }
 0x2cc   : > { %782 = vst [vmem:[%s1291_s28 + $0x58] sm:$0xff] %v766_v5 }
 0x2cd   : > { %780 = vst [vmem:[%s1291_s28 + $0x48] sm:$0xff] %v764_v6  ;;  %v1057_v7 = vpop.f32.mrb[20].mxu1 }
 0x2ce   : > { %v749_v8 = vadd.f32 %v1057_v7, %v904_v34  ;;  %v740_v9 = vpop.f32.mrb[21].mxu1 }
 0x2cf   : > { %v741_v10 = vadd.f32 %v904_v34, %v740_v9  ;;  %v1058_v11 = vpop.f32.mrb[22].mxu1 }
 0x2d0   : > { %v769_v12 = vmax.f32 %v749_v8, 0.0  ;;  %v752_v13 = vadd.f32 %v1058_v11, %v904_v34  ;;  %v743_v14 = vpop.f32.mrb[23].mxu1 }
 0x2d1   : > { %v767_v15 = vmax.f32 %v741_v10, 0.0  ;;  %v744_v16 = vadd.f32 %v904_v34, %v743_v14 }
 0x2d2   : > { %785 = vst [vmem:[%s1291_s28 + $0x70] sm:$0xff] %v769_v12  ;;  %v770_v17 = vmax.f32 %v752_v13, 0.0 }
 0x2d3   : > { %783 = vst [vmem:[%s1291_s28 + $0x60] sm:$0xff] %v767_v15  ;;  %v768_v18 = vmax.f32 %v744_v16, 0.0 }
 0x2d4   : > { %786 = vst [vmem:[%s1291_s28 + $0x78] sm:$0xff] %v770_v17 }
 0x2d5   : > { %784 = vst [vmem:[%s1291_s28 + $0x68] sm:$0xff] %v768_v18 }
 0x2d6 PF: > { %s13_s12 = sadd.s32 1, %s1113_s12  }
 0x2d7   : > { %p10_p4 = scmp.ge.s32.totalorder %s13_s12, 4  }
 0x2d9   :  { %12 = sbr.rel (!%p10_p4) target bundleno = 1 (0x1), region = 66 }

</bundles_post_ra>
